<compile_context>
chip_gen: v5e
topology: v5e:2x2
jax: 0.10.0
libtpu: 0.0.40
codegen_flags: <defaults>
</compile_context>

<pallas_src>
import functools
import math

import jax
import jax.numpy as jnp
from jax.experimental import pallas as pl
from jax.experimental.pallas import tpu as pltpu

D = 2                    # manifold dimension (shared by K1, K2)
F_SHAPE = (2, 2)         # shared F_shape
F_FLAT = F_SHAPE[0] * F_SHAPE[1]
W_DIM = 1                # periodic dim (wrapped by K2)
ORDER = 3                # periodic images on each side (WrappedKernel order)
PERIOD = 2.0 * math.pi
LANE = 128               # lane width
MAX_ROWS = 512           # sublane rows per grid step -> up to 65536 points/step
MIN_ROWS = 8             # (8,128) tiling floor
PARAM_COLS = 5 + (ORDER - 1)   # [scale, ni0, ni1, g1, c, D2..D_ORDER]


def _product_kernel(params_ref, x_ref, o_ref, *, order, exp_in_bf16):
    # params_ref: (F_FLAT, PARAM_COLS) f32 in SMEM:
    #   [scale1*scale2, -1/(2*sigma1^2), -1/(2*sigma2^2), 2*P*ni1, P^2*ni1, D_2, .., D_order]
    # x_ref:      (D, BS, 128) f32   points packed sublane x lane
    # o_ref:      (F_FLAT, BS, 128) f32
    inv_period = 1.0 / PERIOD

    z0 = x_ref[0]                                         # (BS, 128) non-wrapped dim
    x1 = x_ref[1]
    # Periodic wrap without jnp.mod (no divide on the saturated EUP slot):
    # z1 in ~[-P/2, P/2]; the kernel is P-periodic so either boundary is fine.
    z1 = x1 - PERIOD * jnp.round(x1 * inv_period)
    z0sq = z0 * z0
    z1sq = z1 * z1

    if exp_in_bf16:
        # Optional fast path for v6e/v7x (bf16 EUP). Not bit-compatible with f32.
        def _exp(a):
            return jnp.exp(a.astype(jnp.bfloat16)).astype(jnp.float32)
    else:
        _exp = jnp.exp

    for a in range(F_FLAT):                               # F_FLAT = 4, static unroll
        scale = params_ref[a, 0]                          # folded scale1*scale2
        ni0 = params_ref[a, 1]                            # -1/(2*sigma1^2)
        ni1 = params_ref[a, 2]                            # -1/(2*sigma2^2)
        g1 = params_ref[a, 3]                             # 2*P*ni1
        c = params_ref[a, 4]                              # P^2*ni1

        # Fused K1*K2 central factor: exp(z0^2*ni0) * exp(z1^2*ni1) in one exp.
        e = _exp(z0sq * ni0 + z1sq * ni1)

        # Periodic-image generators (both <= 1 since |z1| <= P/2):
        #   G = exp((2P*z1 + P^2)*ni1) = term(+1)/E,  H = exp((-2P*z1 + P^2)*ni1) = term(-1)/E
        u = g1 * z1
        g = _exp(u + c)
        h = _exp(c - u)

        # Image sum S = 1 + sum_{n=1..order} D_n * (G^n + H^n), D_1 = 1.
        s = 1.0 + (g + h)
        gp = g
        hp = h
        for n in range(2, order + 1):                     # pure VPU multiplies/adds
            gp = gp * g
            hp = hp * h
            dn = params_ref[a, 3 + n]                     # D_n = exp(n(n-1)*P^2*ni1)
            s = s + dn * (gp + hp)

        o_ref[a] = (scale * (e * s)).astype(o_ref.dtype)


@functools.partial(jax.jit, static_argnames=("block_rows", "exp_in_bf16"))
def _forward_jit(x, scale1, sigma1, scale2, sigma2, *, block_rows, exp_in_bf16):
    batch_shape = x.shape[:-1]
    n = 1
    for s in batch_shape:
        n *= s

    n_rows = pl.cdiv(n, LANE)
    grid_steps = pl.cdiv(n_rows, block_rows)
    n_rows_pad = grid_steps * block_rows
    n_pad = n_rows_pad * LANE

    # --- fused preprocessing (single jit with the pallas_call) ---------------
    x_flat = x.reshape(n, D).astype(jnp.float32)
    x_t = jnp.zeros((D, n_pad), jnp.float32).at[:, :n].set(x_flat.T)
    x_t = x_t.reshape(D, n_rows_pad, LANE)

    # Fold amplitudes and exponent coefficients -> no divides / extra exps in-kernel.
    scale_c = (scale1 * scale2).reshape(F_FLAT).astype(jnp.float32)
    ni0 = (-0.5 / (sigma1 * sigma1)).reshape(F_FLAT).astype(jnp.float32)
    ni1 = (-0.5 / (sigma2 * sigma2)).reshape(F_FLAT).astype(jnp.float32)
    g1 = (2.0 * PERIOD) * ni1
    c = (PERIOD * PERIOD) * ni1
    d_cols = [jnp.exp(float(nn * (nn - 1)) * c) for nn in range(2, ORDER + 1)]
    params = jnp.stack([scale_c, ni0, ni1, g1, c, *d_cols], axis=-1)  # (F_FLAT, PARAM_COLS)

    out = pl.pallas_call(
        functools.partial(_product_kernel, order=ORDER, exp_in_bf16=exp_in_bf16),
        out_shape=jax.ShapeDtypeStruct((F_FLAT, n_rows_pad, LANE), jnp.float32),
        grid_spec=pltpu.PrefetchScalarGridSpec(
            num_scalar_prefetch=0,
            grid=(grid_steps,),
            in_specs=[
                pl.BlockSpec(memory_space=pltpu.MemorySpace.SMEM),         # params
                pl.BlockSpec((D, block_rows, LANE), lambda i: (0, i, 0)),  # points
            ],
            out_specs=pl.BlockSpec((F_FLAT, block_rows, LANE), lambda i: (0, i, 0)),
        ),
        compiler_params=pltpu.CompilerParams(
            dimension_semantics=("parallel",),
            vmem_limit_bytes=32 * 1024 * 1024),
    )(params, x_t)

    # --- fused postprocessing: back to the module's (..., 2, 2) layout -------
    out = out.reshape(F_FLAT, n_pad)[:, :n]               # (F_FLAT, N), lane-dense
    return out.T.reshape(*batch_shape, *F_SHAPE)


def product_kernel_forward(x, scale1, sigma1, scale2, sigma2, *, exp_in_bf16=False):
    """ProductKernel(K1, K2).forward(x, y=0).  x: (..., D). Returns (..., 2, 2) f32.

    exp_in_bf16=True is an optional accuracy/speed trade-off for v6e/v7x only
    (bf16 EUP); leave False on v5e and whenever 1e-5 accuracy is required.
    """
    assert x.shape[-1] == D
    n = 1
    for s in x.shape[:-1]:
        n *= s

    # Tile choice (host-side, shape-static): fat lane-dense blocks, but keep
    # >= 2 grid steps when possible so v7x's second TensorCore gets work.
    n_rows = pl.cdiv(n, LANE)
    block_rows = MAX_ROWS
    while block_rows > MIN_ROWS and pl.cdiv(n_rows, block_rows) < 2:
        block_rows //= 2

    return _forward_jit(x, scale1, sigma1, scale2, sigma2,
                        block_rows=block_rows, exp_in_bf16=exp_in_bf16)


def _reference_forward(x, scale1, sigma1, scale2, sigma2):
    """Pure-JAX reference: K1(x,0) * K2(x,0) with the full 2*ORDER+1 image sum."""
    x = x.astype(jnp.float32)
    half_p = 0.5 * PERIOD
    z0 = x[..., 0][..., None, None]
    z1 = (jnp.mod(x[..., W_DIM] + half_p, PERIOD) - half_p)[..., None, None]
    k1 = scale1 * jnp.exp(-0.5 * z0 * z0 / (sigma1 * sigma1))
    acc = jnp.zeros(x.shape[:-1] + F_SHAPE, jnp.float32)
    for n in range(-ORDER, ORDER + 1):
        z1s = z1 + float(n) * PERIOD
        acc = acc + jnp.exp(-0.5 * z1s * z1s / (sigma2 * sigma2))
    k2 = scale2 * acc
    return k1 * k2


if __name__ == "__main__":
    # Deterministic parameters for the two factor kernels (F_shape = (2, 2)).
    scale1 = jnp.array([[1.0, 0.9], [0.8, 1.1]], jnp.float32)
    sigma1 = jnp.array([[0.3, 0.5], [0.7, 0.9]], jnp.float32)   # K1 (R dim) widths
    scale2 = jnp.array([[1.0, -0.55], [1.0, -1.1]], jnp.float32)
    sigma2 = jnp.array([[0.4, 0.6], [0.8, 1.0]], jnp.float32)   # K2 (S^1 dim) widths

    # Example input: (32, 64) points on the D=2 manifold (dim 1 periodic).
    key = jax.random.PRNGKey(0)
    x = jax.random.uniform(key, (32, 64, D), jnp.float32,
                           minval=-math.pi, maxval=math.pi)

    out = product_kernel_forward(x, scale1, sigma1, scale2, sigma2)
    out = jax.block_until_ready(out)

    ref = _reference_forward(x, scale1, sigma1, scale2, sigma2)
    assert out.shape == (32, 64, 2, 2), out.shape
    assert jnp.allclose(out, ref, atol=1e-5, rtol=1e-5), \
        float(jnp.max(jnp.abs(out - ref)))

    # TODO(synk): Kernel.discretize() (gridtools-dependent host-side indexing /
    # wrap-padding machinery) is not part of the hot forward path and is left out.
    print("KERNEL_OK")
</pallas_src>

<mosaic_0001>
module attributes {stable_mosaic.version = 11 : i64} {
  func.func @_product_kernel(%arg0: i32, %arg1: memref<4x7xf32, #tpu.memory_space<smem>>, %arg2: memref<2x8x128xf32, #tpu.memory_space<vmem>>, %arg3: memref<4x8x128xf32, #tpu.memory_space<vmem>>) attributes {dimension_semantics = [#tpu.dimension_semantics<parallel>], iteration_bounds = array<i64: 2>, scalar_prefetch = 0 : i64, scratch_operands = 0 : i64, tpu.core_type = #tpu.core_type<tc>, window_params = [{transform_indices = @transform_0, window_bounds = array<i64: 4, 7>}, {transform_indices = @transform_1, window_bounds = array<i64: 2, 8, 128>}, {transform_indices = @transform_2, window_bounds = array<i64: 4, 8, 128>}]} {
    %c0 = arith.constant 0 : index
    %c0_0 = arith.constant 0 : index
    %c0_1 = arith.constant 0 : index
    %0 = vector.load %arg2[%c0, %c0_0, %c0_1] : memref<2x8x128xf32, #tpu.memory_space<vmem>>, vector<1x8x128xf32>
    %1 = vector.shape_cast %0 : vector<1x8x128xf32> to vector<8x128xf32>
    %c1 = arith.constant 1 : index
    %c0_2 = arith.constant 0 : index
    %c0_3 = arith.constant 0 : index
    %2 = vector.load %arg2[%c1, %c0_2, %c0_3] : memref<2x8x128xf32, #tpu.memory_space<vmem>>, vector<1x8x128xf32>
    %3 = vector.shape_cast %2 : vector<1x8x128xf32> to vector<8x128xf32>
    %cst = arith.constant 0.159154937 : f32
    %4 = vector.broadcast %cst : f32 to vector<8x128xf32>
    %5 = arith.mulf %3, %4 : vector<8x128xf32>
    %6 = math.roundeven %5 : vector<8x128xf32>
    %cst_4 = arith.constant 6.28318548 : f32
    %7 = vector.broadcast %cst_4 : f32 to vector<8x128xf32>
    %8 = arith.mulf %7, %6 : vector<8x128xf32>
    %9 = arith.subf %3, %8 : vector<8x128xf32>
    %10 = arith.mulf %1, %1 : vector<8x128xf32>
    %11 = arith.mulf %9, %9 : vector<8x128xf32>
    %c0_5 = arith.constant 0 : index
    %c0_6 = arith.constant 0 : index
    %12 = memref.load %arg1[%c0_5, %c0_6] : memref<4x7xf32, #tpu.memory_space<smem>>
    %c0_7 = arith.constant 0 : index
    %c1_8 = arith.constant 1 : index
    %13 = memref.load %arg1[%c0_7, %c1_8] : memref<4x7xf32, #tpu.memory_space<smem>>
    %c0_9 = arith.constant 0 : index
    %c2 = arith.constant 2 : index
    %14 = memref.load %arg1[%c0_9, %c2] : memref<4x7xf32, #tpu.memory_space<smem>>
    %c0_10 = arith.constant 0 : index
    %c3 = arith.constant 3 : index
    %15 = memref.load %arg1[%c0_10, %c3] : memref<4x7xf32, #tpu.memory_space<smem>>
    %c0_11 = arith.constant 0 : index
    %c4 = arith.constant 4 : index
    %16 = memref.load %arg1[%c0_11, %c4] : memref<4x7xf32, #tpu.memory_space<smem>>
    %17 = vector.broadcast %13 : f32 to vector<8x128xf32>
    %18 = arith.mulf %10, %17 : vector<8x128xf32>
    %19 = vector.broadcast %14 : f32 to vector<8x128xf32>
    %20 = arith.mulf %11, %19 : vector<8x128xf32>
    %21 = arith.addf %18, %20 : vector<8x128xf32>
    %22 = math.exp %21 : vector<8x128xf32>
    %23 = vector.broadcast %15 : f32 to vector<8x128xf32>
    %24 = arith.mulf %23, %9 : vector<8x128xf32>
    %25 = vector.broadcast %16 : f32 to vector<8x128xf32>
    %26 = arith.addf %24, %25 : vector<8x128xf32>
    %27 = math.exp %26 : vector<8x128xf32>
    %28 = vector.broadcast %16 : f32 to vector<8x128xf32>
    %29 = arith.subf %28, %24 : vector<8x128xf32>
    %30 = math.exp %29 : vector<8x128xf32>
    %31 = arith.addf %27, %30 : vector<8x128xf32>
    %cst_12 = arith.constant 1.000000e+00 : f32
    %32 = vector.broadcast %cst_12 : f32 to vector<8x128xf32>
    %33 = arith.addf %32, %31 : vector<8x128xf32>
    %34 = arith.mulf %27, %27 : vector<8x128xf32>
    %35 = arith.mulf %30, %30 : vector<8x128xf32>
    %c0_13 = arith.constant 0 : index
    %c5 = arith.constant 5 : index
    %36 = memref.load %arg1[%c0_13, %c5] : memref<4x7xf32, #tpu.memory_space<smem>>
    %37 = arith.addf %34, %35 : vector<8x128xf32>
    %38 = vector.broadcast %36 : f32 to vector<8x128xf32>
    %39 = arith.mulf %38, %37 : vector<8x128xf32>
    %40 = arith.addf %33, %39 : vector<8x128xf32>
    %41 = arith.mulf %34, %27 : vector<8x128xf32>
    %42 = arith.mulf %35, %30 : vector<8x128xf32>
    %c0_14 = arith.constant 0 : index
    %c6 = arith.constant 6 : index
    %43 = memref.load %arg1[%c0_14, %c6] : memref<4x7xf32, #tpu.memory_space<smem>>
    %44 = arith.addf %41, %42 : vector<8x128xf32>
    %45 = vector.broadcast %43 : f32 to vector<8x128xf32>
    %46 = arith.mulf %45, %44 : vector<8x128xf32>
    %47 = arith.addf %40, %46 : vector<8x128xf32>
    %48 = arith.mulf %22, %47 : vector<8x128xf32>
    %49 = vector.broadcast %12 : f32 to vector<8x128xf32>
    %50 = arith.mulf %49, %48 : vector<8x128xf32>
    %c0_15 = arith.constant 0 : index
    %c0_16 = arith.constant 0 : index
    %c0_17 = arith.constant 0 : index
    %51 = vector.load %arg3[%c0_15, %c0_16, %c0_17] : memref<4x8x128xf32, #tpu.memory_space<vmem>>, vector<1x8x128xf32>
    %52 = vector.shape_cast %51 : vector<1x8x128xf32> to vector<8x128xf32>
    %53 = vector.shape_cast %50 : vector<8x128xf32> to vector<1x8x128xf32>
    tpu.vector_store %arg3[%c0_15, %c0_16, %c0_17], %53 {strides = array<i32>} : memref<4x8x128xf32, #tpu.memory_space<vmem>>, vector<1x8x128xf32>,
    %c1_18 = arith.constant 1 : index
    %c0_19 = arith.constant 0 : index
    %54 = memref.load %arg1[%c1_18, %c0_19] : memref<4x7xf32, #tpu.memory_space<smem>>
    %c1_20 = arith.constant 1 : index
    %c1_21 = arith.constant 1 : index
    %55 = memref.load %arg1[%c1_20, %c1_21] : memref<4x7xf32, #tpu.memory_space<smem>>
    %c1_22 = arith.constant 1 : index
    %c2_23 = arith.constant 2 : index
    %56 = memref.load %arg1[%c1_22, %c2_23] : memref<4x7xf32, #tpu.memory_space<smem>>
    %c1_24 = arith.constant 1 : index
    %c3_25 = arith.constant 3 : index
    %57 = memref.load %arg1[%c1_24, %c3_25] : memref<4x7xf32, #tpu.memory_space<smem>>
    %c1_26 = arith.constant 1 : index
    %c4_27 = arith.constant 4 : index
    %58 = memref.load %arg1[%c1_26, %c4_27] : memref<4x7xf32, #tpu.memory_space<smem>>
    %59 = vector.broadcast %55 : f32 to vector<8x128xf32>
    %60 = arith.mulf %10, %59 : vector<8x128xf32>
    %61 = vector.broadcast %56 : f32 to vector<8x128xf32>
    %62 = arith.mulf %11, %61 : vector<8x128xf32>
    %63 = arith.addf %60, %62 : vector<8x128xf32>
    %64 = math.exp %63 : vector<8x128xf32>
    %65 = vector.broadcast %57 : f32 to vector<8x128xf32>
    %66 = arith.mulf %65, %9 : vector<8x128xf32>
    %67 = vector.broadcast %58 : f32 to vector<8x128xf32>
    %68 = arith.addf %66, %67 : vector<8x128xf32>
    %69 = math.exp %68 : vector<8x128xf32>
    %70 = vector.broadcast %58 : f32 to vector<8x128xf32>
    %71 = arith.subf %70, %66 : vector<8x128xf32>
    %72 = math.exp %71 : vector<8x128xf32>
    %73 = arith.addf %69, %72 : vector<8x128xf32>
    %cst_28 = arith.constant 1.000000e+00 : f32
    %74 = vector.broadcast %cst_28 : f32 to vector<8x128xf32>
    %75 = arith.addf %74, %73 : vector<8x128xf32>
    %76 = arith.mulf %69, %69 : vector<8x128xf32>
    %77 = arith.mulf %72, %72 : vector<8x128xf32>
    %c1_29 = arith.constant 1 : index
    %c5_30 = arith.constant 5 : index
    %78 = memref.load %arg1[%c1_29, %c5_30] : memref<4x7xf32, #tpu.memory_space<smem>>
    %79 = arith.addf %76, %77 : vector<8x128xf32>
    %80 = vector.broadcast %78 : f32 to vector<8x128xf32>
    %81 = arith.mulf %80, %79 : vector<8x128xf32>
    %82 = arith.addf %75, %81 : vector<8x128xf32>
    %83 = arith.mulf %76, %69 : vector<8x128xf32>
    %84 = arith.mulf %77, %72 : vector<8x128xf32>
    %c1_31 = arith.constant 1 : index
    %c6_32 = arith.constant 6 : index
    %85 = memref.load %arg1[%c1_31, %c6_32] : memref<4x7xf32, #tpu.memory_space<smem>>
    %86 = arith.addf %83, %84 : vector<8x128xf32>
    %87 = vector.broadcast %85 : f32 to vector<8x128xf32>
    %88 = arith.mulf %87, %86 : vector<8x128xf32>
    %89 = arith.addf %82, %88 : vector<8x128xf32>
    %90 = arith.mulf %64, %89 : vector<8x128xf32>
    %91 = vector.broadcast %54 : f32 to vector<8x128xf32>
    %92 = arith.mulf %91, %90 : vector<8x128xf32>
    %c1_33 = arith.constant 1 : index
    %c0_34 = arith.constant 0 : index
    %c0_35 = arith.constant 0 : index
    %93 = vector.load %arg3[%c1_33, %c0_34, %c0_35] : memref<4x8x128xf32, #tpu.memory_space<vmem>>, vector<1x8x128xf32>
    %94 = vector.shape_cast %93 : vector<1x8x128xf32> to vector<8x128xf32>
    %95 = vector.shape_cast %92 : vector<8x128xf32> to vector<1x8x128xf32>
    tpu.vector_store %arg3[%c1_33, %c0_34, %c0_35], %95 {strides = array<i32>} : memref<4x8x128xf32, #tpu.memory_space<vmem>>, vector<1x8x128xf32>,
    %c2_36 = arith.constant 2 : index
    %c0_37 = arith.constant 0 : index
    %96 = memref.load %arg1[%c2_36, %c0_37] : memref<4x7xf32, #tpu.memory_space<smem>>
    %c2_38 = arith.constant 2 : index
    %c1_39 = arith.constant 1 : index
    %97 = memref.load %arg1[%c2_38, %c1_39] : memref<4x7xf32, #tpu.memory_space<smem>>
    %c2_40 = arith.constant 2 : index
    %c2_41 = arith.constant 2 : index
    %98 = memref.load %arg1[%c2_40, %c2_41] : memref<4x7xf32, #tpu.memory_space<smem>>
    %c2_42 = arith.constant 2 : index
    %c3_43 = arith.constant 3 : index
    %99 = memref.load %arg1[%c2_42, %c3_43] : memref<4x7xf32, #tpu.memory_space<smem>>
    %c2_44 = arith.constant 2 : index
    %c4_45 = arith.constant 4 : index
    %100 = memref.load %arg1[%c2_44, %c4_45] : memref<4x7xf32, #tpu.memory_space<smem>>
    %101 = vector.broadcast %97 : f32 to vector<8x128xf32>
    %102 = arith.mulf %10, %101 : vector<8x128xf32>
    %103 = vector.broadcast %98 : f32 to vector<8x128xf32>
    %104 = arith.mulf %11, %103 : vector<8x128xf32>
    %105 = arith.addf %102, %104 : vector<8x128xf32>
    %106 = math.exp %105 : vector<8x128xf32>
    %107 = vector.broadcast %99 : f32 to vector<8x128xf32>
    %108 = arith.mulf %107, %9 : vector<8x128xf32>
    %109 = vector.broadcast %100 : f32 to vector<8x128xf32>
    %110 = arith.addf %108, %109 : vector<8x128xf32>
    %111 = math.exp %110 : vector<8x128xf32>
    %112 = vector.broadcast %100 : f32 to vector<8x128xf32>
    %113 = arith.subf %112, %108 : vector<8x128xf32>
    %114 = math.exp %113 : vector<8x128xf32>
    %115 = arith.addf %111, %114 : vector<8x128xf32>
    %cst_46 = arith.constant 1.000000e+00 : f32
    %116 = vector.broadcast %cst_46 : f32 to vector<8x128xf32>
    %117 = arith.addf %116, %115 : vector<8x128xf32>
    %118 = arith.mulf %111, %111 : vector<8x128xf32>
    %119 = arith.mulf %114, %114 : vector<8x128xf32>
    %c2_47 = arith.constant 2 : index
    %c5_48 = arith.constant 5 : index
    %120 = memref.load %arg1[%c2_47, %c5_48] : memref<4x7xf32, #tpu.memory_space<smem>>
    %121 = arith.addf %118, %119 : vector<8x128xf32>
    %122 = vector.broadcast %120 : f32 to vector<8x128xf32>
    %123 = arith.mulf %122, %121 : vector<8x128xf32>
    %124 = arith.addf %117, %123 : vector<8x128xf32>
    %125 = arith.mulf %118, %111 : vector<8x128xf32>
    %126 = arith.mulf %119, %114 : vector<8x128xf32>
    %c2_49 = arith.constant 2 : index
    %c6_50 = arith.constant 6 : index
    %127 = memref.load %arg1[%c2_49, %c6_50] : memref<4x7xf32, #tpu.memory_space<smem>>
    %128 = arith.addf %125, %126 : vector<8x128xf32>
    %129 = vector.broadcast %127 : f32 to vector<8x128xf32>
    %130 = arith.mulf %129, %128 : vector<8x128xf32>
    %131 = arith.addf %124, %130 : vector<8x128xf32>
    %132 = arith.mulf %106, %131 : vector<8x128xf32>
    %133 = vector.broadcast %96 : f32 to vector<8x128xf32>
    %134 = arith.mulf %133, %132 : vector<8x128xf32>
    %c2_51 = arith.constant 2 : index
    %c0_52 = arith.constant 0 : index
    %c0_53 = arith.constant 0 : index
    %135 = vector.load %arg3[%c2_51, %c0_52, %c0_53] : memref<4x8x128xf32, #tpu.memory_space<vmem>>, vector<1x8x128xf32>
    %136 = vector.shape_cast %135 : vector<1x8x128xf32> to vector<8x128xf32>
    %137 = vector.shape_cast %134 : vector<8x128xf32> to vector<1x8x128xf32>
    tpu.vector_store %arg3[%c2_51, %c0_52, %c0_53], %137 {strides = array<i32>} : memref<4x8x128xf32, #tpu.memory_space<vmem>>, vector<1x8x128xf32>,
    %c3_54 = arith.constant 3 : index
    %c0_55 = arith.constant 0 : index
    %138 = memref.load %arg1[%c3_54, %c0_55] : memref<4x7xf32, #tpu.memory_space<smem>>
    %c3_56 = arith.constant 3 : index
    %c1_57 = arith.constant 1 : index
    %139 = memref.load %arg1[%c3_56, %c1_57] : memref<4x7xf32, #tpu.memory_space<smem>>
    %c3_58 = arith.constant 3 : index
    %c2_59 = arith.constant 2 : index
    %140 = memref.load %arg1[%c3_58, %c2_59] : memref<4x7xf32, #tpu.memory_space<smem>>
    %c3_60 = arith.constant 3 : index
    %c3_61 = arith.constant 3 : index
    %141 = memref.load %arg1[%c3_60, %c3_61] : memref<4x7xf32, #tpu.memory_space<smem>>
    %c3_62 = arith.constant 3 : index
    %c4_63 = arith.constant 4 : index
    %142 = memref.load %arg1[%c3_62, %c4_63] : memref<4x7xf32, #tpu.memory_space<smem>>
    %143 = vector.broadcast %139 : f32 to vector<8x128xf32>
    %144 = arith.mulf %10, %143 : vector<8x128xf32>
    %145 = vector.broadcast %140 : f32 to vector<8x128xf32>
    %146 = arith.mulf %11, %145 : vector<8x128xf32>
    %147 = arith.addf %144, %146 : vector<8x128xf32>
    %148 = math.exp %147 : vector<8x128xf32>
    %149 = vector.broadcast %141 : f32 to vector<8x128xf32>
    %150 = arith.mulf %149, %9 : vector<8x128xf32>
    %151 = vector.broadcast %142 : f32 to vector<8x128xf32>
    %152 = arith.addf %150, %151 : vector<8x128xf32>
    %153 = math.exp %152 : vector<8x128xf32>
    %154 = vector.broadcast %142 : f32 to vector<8x128xf32>
    %155 = arith.subf %154, %150 : vector<8x128xf32>
    %156 = math.exp %155 : vector<8x128xf32>
    %157 = arith.addf %153, %156 : vector<8x128xf32>
    %cst_64 = arith.constant 1.000000e+00 : f32
    %158 = vector.broadcast %cst_64 : f32 to vector<8x128xf32>
    %159 = arith.addf %158, %157 : vector<8x128xf32>
    %160 = arith.mulf %153, %153 : vector<8x128xf32>
    %161 = arith.mulf %156, %156 : vector<8x128xf32>
    %c3_65 = arith.constant 3 : index
    %c5_66 = arith.constant 5 : index
    %162 = memref.load %arg1[%c3_65, %c5_66] : memref<4x7xf32, #tpu.memory_space<smem>>
    %163 = arith.addf %160, %161 : vector<8x128xf32>
    %164 = vector.broadcast %162 : f32 to vector<8x128xf32>
    %165 = arith.mulf %164, %163 : vector<8x128xf32>
    %166 = arith.addf %159, %165 : vector<8x128xf32>
    %167 = arith.mulf %160, %153 : vector<8x128xf32>
    %168 = arith.mulf %161, %156 : vector<8x128xf32>
    %c3_67 = arith.constant 3 : index
    %c6_68 = arith.constant 6 : index
    %169 = memref.load %arg1[%c3_67, %c6_68] : memref<4x7xf32, #tpu.memory_space<smem>>
    %170 = arith.addf %167, %168 : vector<8x128xf32>
    %171 = vector.broadcast %169 : f32 to vector<8x128xf32>
    %172 = arith.mulf %171, %170 : vector<8x128xf32>
    %173 = arith.addf %166, %172 : vector<8x128xf32>
    %174 = arith.mulf %148, %173 : vector<8x128xf32>
    %175 = vector.broadcast %138 : f32 to vector<8x128xf32>
    %176 = arith.mulf %175, %174 : vector<8x128xf32>
    %c3_69 = arith.constant 3 : index
    %c0_70 = arith.constant 0 : index
    %c0_71 = arith.constant 0 : index
    %177 = vector.load %arg3[%c3_69, %c0_70, %c0_71] : memref<4x8x128xf32, #tpu.memory_space<vmem>>, vector<1x8x128xf32>
    %178 = vector.shape_cast %177 : vector<1x8x128xf32> to vector<8x128xf32>
    %179 = vector.shape_cast %176 : vector<8x128xf32> to vector<1x8x128xf32>
    tpu.vector_store %arg3[%c3_69, %c0_70, %c0_71], %179 {strides = array<i32>} : memref<4x8x128xf32, #tpu.memory_space<vmem>>, vector<1x8x128xf32>,
    return
  }
  func.func @transform_0(%arg0: i32) -> (i32, i32) {
    %c0_i32 = arith.constant 0 : i32
    %c0_i32_0 = arith.constant 0 : i32
    %c0_i32_1 = arith.constant 0 : i32
    return %c0_i32, %c0_i32_0 : i32, i32
  }
  func.func @transform_1(%arg0: i32) -> (i32, i32, i32) {
    %c0_i32 = arith.constant 0 : i32
    %c0_i32_0 = arith.constant 0 : i32
    %c0_i32_1 = arith.constant 0 : i32
    return %c0_i32, %arg0, %c0_i32_0 : i32, i32, i32
  }
  func.func @transform_2(%arg0: i32) -> (i32, i32, i32) {
    %c0_i32 = arith.constant 0 : i32
    %c0_i32_0 = arith.constant 0 : i32
    %c0_i32_1 = arith.constant 0 : i32
    return %c0_i32, %arg0, %c0_i32_0 : i32, i32, i32
  }
}

</mosaic_0001>

<bundles_post_ra>
// kernel: mul.7
= control target key start
LH: loop header
LB: loop body
LE: loop exit
PB: predicated region body
PF: predicated region fallthrough
CT: control target
= control target key end

     0   :  { %3 = vsyncpa [#allocation1], 0  ;;  %s50_s11 = smov [#allocation0]   ;;  %s75_s0 = inlined_call_operand.hbm [shape: f32[2,2], index: 0, kind: input, shape index: {}]   ;;  %s76_s1 = inlined_call_operand.vmem [shape: f32[2,2], index: 1, kind: input, shape index: {}]   ;;  %s77_s2 = inlined_call_operand.vmem [shape: f32[2,2], index: 2, kind: output, shape index: {}]  }
   0x1   :  { %s7_s0 = sshll.u32 %s75_s0, 4  ;;  %s9_s12 = sshll.u32 %s50_s11, 4  ;;  %s8_s0 = int_to_ptr.hbm [resolvable:$true] %s7_s0  ;;  %s10_s12 = int_to_ptr.vmem [resolvable:$true] %s9_s12 }
   0x2   :  { %12 = dma.hbm_to_vmem [thread:$0]  %s8_s0, 32, %s10_s12, [#allocation1]  }
   0x3   :  { %48 = dma.done.wait [#allocation1], 32  }
   0x4   :  { %49 = vsyncadd [#allocation1], 4294967264  ;;  %v15_v0 = vld [vmem:[#allocation0] sm:$0x3] }
   0x5   :  { %v16_v1 = vld [vmem:[%s76_s1] sm:$0x3] }
   0x6   :  { %v19_v2 = vmul.f32 %v16_v1, %v15_v0 }
   0x8   :  { %21 = vst [vmem:[%s77_s2] sm:$0x3] %v19_v2 }
   0x9   :  { %22 = vsyncpa [#allocation1], 1 }

// kernel: _forward_jit.1
= control target key start
LH: loop header
LB: loop body
LE: loop exit
PB: predicated region body
PF: predicated region fallthrough
CT: control target
= control target key end

     0   :  { %7 = vsyncpa [#allocation3], 0  ;;  %s661_s9 = smov 0   ;;  %s663_s10 = smov 0   ;;  %s832_s0 = inlined_call_operand.vmem [shape: f32[4,7], index: 0, kind: input, shape index: {}]   ;;  %s833_s1 = inlined_call_operand.vmem [shape: f32[2,16,128], index: 1, kind: input, shape index: {}]   ;;  %s834_s2 = inlined_call_operand.vmem [shape: f32[4,16,128], index: 2, kind: output, shape index: {}]  }
   0x1   :  { %s665_s11 = smov 0  }
   0x2 LB: > { %s677_s12 = sadd.s32 4294967295, %s643_s11   ;;  %s680_s13 = sadd.s32 1, %s643_s11   ;;  %s643_s11 = sphi %s665_s11, %s840_s11   ;;  %s639_s10 = sphi %s663_s10, %s839_s10   ;;  %s635_s9 = sphi %s661_s9, %s838_s9  }
   0x3   : > { %s38_s14 = ssub.s32 %s643_s11, %s680_s13  ;;  %s41_s15 = sadd.s32 1, %s639_s10 }
   0x4   : > { %p39_p0 = scmp.eq.s32.totalorder %s38_s14, 0  ;;  %p48_p1 = scmp.ne.s32.totalorder %s639_s10, %s635_s9 }
   0x5   : > { %p49_p2 = scmp.eq.s32.totalorder %s643_s11, 0  ;;  %p78_p3 = scmp.eq.s32.totalorder %s677_s12, 1 }
   0x6   : > { %s690_s16 = scalar_select %p39_p0, %s639_s10, %s41_s15  }
   0x7   : > { %p692_p4 = por %p49_p2, %p48_p1  ;;  %p696_p5 = por %p78_p3, %p48_p1 }
   0x8   : > { %p491_p6 = scmp.ge.s32.totalorder %s643_s11, 1  ;;  %p91_p7 = scmp.lt.s32.totalorder %s643_s11, 3 }
   0x9   : > { %p551_p8 = scmp.eq.s32.totalorder %s677_s12, 0  ;;  %s103_s22 = sshll.u32 %s832_s0, 4  ;;  %s104_s22 = int_to_ptr.vmem [resolvable:$true] %s103_s22 }
   0xa   : > { %p703_p9 = pnand %p491_p6, %p91_p7  ;;  %s645_s23 = smov [#allocation2]  }
   0xb   : > { %p493_p12 = scmp.ge.s32.totalorder %s643_s11, 2 }
   0xc   : > { %p547_p10 = pneg %p703_p9 }
   0xd   : > { %110 = sbr.rel (%p493_p12) target bundleno = 24 (0x18), region = 20 }
   0xe   : > { %p548_p11 = pnand %p551_p8, %p547_p10 }
  0x10   : > { %550 = dma.vmem_to_smem (!%p548_p11), %s104_s22, 64, %s645_s23, [#allocation3]  }
  0x12   : > { %113 = sbr.rel (!%p692_p4) target bundleno = 24 (0x18), region = 24  ;;  %s115_s24 = sand.u32 (%p692_p4), 1, %s639_s10  }
  0x13   : > { %s495_s25 = sshll.u32 (%p692_p4), %s643_s11, 3  ;;  %s494_s26 = sshll.u32 (%p692_p4), %s115_s24, 4 }
  0x14   : > { %s119_s29 = scalar_lea.vmem (%p692_p4), %s833_s1, %s495_s25  ;;  %s117_s30 = scalar_lea.vmem (%p692_p4), [#allocation4], %s494_s26 }
  0x15   : > { %v150_v0 = vld [vmem:[%s119_s29] sm:$0xff] (%p692_p4)  ;;  %v152_v1 = vld [vmem:[%s119_s29 + $0x10] sm:$0xff] (%p692_p4) }
  0x16   : > { %151 = vst [vmem:[%s117_s30] sm:$0xff] (%p692_p4), %v150_v0 }
  0x17   : > { %153 = vst [vmem:[%s117_s30 + $0x8] sm:$0xff] %v152_v1 }
  0x18 PF: > { %162 = sbr.rel (%p703_p9) target bundleno = 98 (0x62), region = 62 }
  0x1d   : > { %630 = dma.done.wait (%p551_p8), [#allocation3], 64  }
  0x1e   : > { %632 = vsyncadd (%p551_p8), [#allocation3], 4294967232  ;;  %s170_s3 = sand.u32 1, %s635_s9  }
  0x1f   : > { %s498_s4 = sshll.u32 %s170_s3, 4 }
  0x20   : > { %s172_s5 = scalar_lea.vmem [#allocation4], %s498_s4 }
  0x21   : > { %176 = sfence }
  0x22   : > { %v500_v2 = vld [vmem:[%s172_s5 + $0x8] sm:$0xff]  ;;  %s501_s6 = sld [smem:[#allocation2 + $0x1]]  ;;  %v191_v9 = vld [vmem:[%s172_s5] sm:$0xff] }
  0x23   : > { %v194_v3 = vmul.f32 0.15915494, %v500_v2  ;;  %s503_s7 = sld [smem:[#allocation2 + $0x3]]  ;;  %v735_v13 = vmul.f32 %v191_v9, %v191_v9 }
  0x24   : > { %s731_s8 = sld [smem:[#allocation2 + $0x2]] }
  0x25   : > { %v537_v4 = vcvt.f32.s32 %v194_v3  ;;  %v535_v5 = vand.u32 2147483647, %v194_v3  ;;  %v540_v7 = vand.u32 2147483648, %v194_v3  ;;  %s733_s11 = sld [smem:[#allocation2 + $0x4]] }
  0x26   : > { %s508_s14 = sld [smem:[#allocation2 + $0x81]] }
  0x27   : > { %v538_v6 = vcvt.s32.f32 %v537_v4  ;;  %vm536_vm0 = vcmp.lt.f32.partialorder %v535_v5, 8388608.0  ;;  %s509_s15 = sld [smem:[#allocation2 + $0x82]] }
  0x28   : > { %s510_s17 = sld [smem:[#allocation2 + $0x83]]  ;;  %v205_v14 = vstv %s501_s6 }
  0x29   : > { %v539_v8 = vand.u32 2147483647, %v538_v6  ;;  %s511_s19 = sld [smem:[#allocation2 + $0x84]]  ;;  %v212_v15 = vstv %s503_s7  ;;  %v206_v22 = vmul.f32 %v205_v14, %v735_v13 }
  0x2a   : > { %s737_s20 = sld [smem:[#allocation2]]  ;;  %v207_v18 = vstv %s731_s8 }
  0x2b   : > { %v541_v10 = vor.u32 %v540_v7, %v539_v8  ;;  %s741_s21 = sld [smem:[#allocation2 + $0x5]]  ;;  %v214_v19 = vstv %s733_s11  ;;  %s499_s11 = sshll.u32 %s170_s3, 5 }
  0x2c   : > { %v246_v17 = vstv %s508_s14  ;;  %s516_s22 = sld [smem:[#allocation2 + $0x101]]  ;;  %s802_s3 = scalar_lea.vmem [#allocation5], %s499_s11 }
  0x2d   : > { %v542_v11 = vsel %vm536_vm0, %v541_v10, %v194_v3  ;;  %v248_v20 = vstv %s509_s15  ;;  %s517_s23 = sld [smem:[#allocation2 + $0x102]]  ;;  %v247_v25 = vmul.f32 %v246_v17, %v735_v13 }
  0x2e   : > { %v196_v12 = vmul.f32 6.2831855, %v542_v11  ;;  %v253_v24 = vstv %s510_s17  ;;  %s518_s24 = sld [smem:[#allocation2 + $0x103]] }
  0x2f   : > { %v255_v27 = vstv %s511_s19  ;;  %s519_s25 = sld [smem:[#allocation2 + $0x104]]  ;;  %s532_s19 = sshll.u32 (%p696_p5), %s677_s12, 3 }
  0x30   : > { %v739_v16 = vsub.f32 %v500_v2, %v196_v12  ;;  %s755_s26 = sld [smem:[#allocation2 + $0x6]]  ;;  %v238_v54 = vstv %s737_s20 }
  0x31   : > { %s757_s27 = sld [smem:[#allocation2 + $0x85]]  ;;  %v227_v52 = vstv %s741_s21 }
  0x32   : > { %v747_v21 = vmul.f32 %v739_v16, %v739_v16  ;;  %v213_v23 = vmul.f32 %v212_v15, %v739_v16  ;;  %v254_v26 = vmul.f32 %v253_v24, %v739_v16  ;;  %s759_s28 = sld [smem:[#allocation2 + $0x86]]  ;;  %v288_v38 = vstv %s516_s22  ;;  %s375_s22 = scalar_lea.vmem (%p696_p5), %s834_s2, %s532_s19 }
  0x33   : > { %v289_v40 = vmul.f32 %v288_v38, %v735_v13  ;;  %s762_s29 = sld [smem:[#allocation2 + $0x181]]  ;;  %v290_v42 = vstv %s517_s23 }
  0x34   : > { %v208_v28 = vmul.f32 %v207_v18, %v747_v21  ;;  %v215_v29 = vadd.f32 %v214_v19, %v213_v23  ;;  %v218_v30 = vsub.f32 %v214_v19, %v213_v23  ;;  %v249_v31 = vmul.f32 %v248_v20, %v747_v21  ;;  %s764_s30 = sld [smem:[#allocation2 + $0x182]] }
  0x35   : > { %v256_v32 = vadd.f32 %v255_v27, %v254_v26  ;;  %v259_v33 = vsub.f32 %v255_v27, %v254_v26  ;;  %v295_v43 = vstv %s518_s24  ;;  %v291_v45 = vmul.f32 %v290_v42, %v747_v21  ;;  %s768_s4 = sld [smem:[#allocation2 + $0x183]] }
  0x36   : > { %v209_v34 = vadd.f32 %v208_v28, %v206_v22  ;;  %v216_v35 = vmul.f32 1.442695, %v215_v29  ;;  %v219_v36 = vmul.f32 1.442695, %v218_v30  ;;  %v250_v37 = vadd.f32 %v249_v31, %v247_v25  ;;  %s770_s5 = sld [smem:[#allocation2 + $0x184]] }
  0x37   : > { %v257_v39 = vmul.f32 1.442695, %v256_v32  ;;  %v260_v41 = vmul.f32 1.442695, %v259_v33  ;;  %v296_v46 = vmul.f32 %v295_v43, %v739_v16  ;;  %v297_v47 = vstv %s519_s25  ;;  %s775_s6 = sld [smem:[#allocation2 + $0x105]] }
  0x38   : > { %578 = vpow2.f32 %v216_v35  ;;  %v210_v44 = vmul.f32 1.442695, %v209_v34  ;;  %v251_v48 = vmul.f32 1.442695, %v250_v37  ;;  %v292_v49 = vadd.f32 %v291_v45, %v289_v40  ;;  %s786_s7 = sld [smem:[#allocation2 + $0x106]] }
  0x39   : > { %580 = vpow2.f32 %v219_v36  ;;  %v298_v50 = vadd.f32 %v297_v47, %v296_v46  ;;  %v301_v51 = vsub.f32 %v297_v47, %v296_v46  ;;  %v234_v53 = vstv %s755_s26  ;;  %s789_s8 = sld [smem:[#allocation2 + $0x80]] }
  0x3a   : > { %582 = vpow2.f32 %v257_v39  ;;  %v268_v56 = vstv %s757_s27  ;;  %v275_v61 = vstv %s759_s28  ;;  %v293_v62 = vmul.f32 1.442695, %v292_v49  ;;  %s793_s14 = sld [smem:[#allocation2 + $0x100]] }
  0x3b   : > { %584 = vpow2.f32 %v260_v41  ;;  %v299_v57 = vmul.f32 1.442695, %v298_v50  ;;  %v302_v58 = vmul.f32 1.442695, %v301_v51  ;;  %v330_v1 = vstv %s762_s29  ;;  %s795_s15 = sld [smem:[#allocation2 + $0x185]] }
  0x3c   : > { %586 = vpow2.f32 %v210_v44  ;;  %v332_v2 = vstv %s764_s30  ;;  %v337_v4 = vstv %s768_s4  ;;  %v339_v5 = vstv %s770_s5  ;;  %s800_s9 = sld [smem:[#allocation2 + $0x186]] }
  0x3d   : > { %588 = vpow2.f32 %v251_v48  ;;  %v331_v12 = vmul.f32 %v330_v1, %v735_v13  ;;  %v333_v14 = vmul.f32 %v332_v2, %v747_v21  ;;  %v338_v15 = vmul.f32 %v337_v4, %v739_v16  ;;  %s523_s17 = sld [smem:[#allocation2 + $0x180]] }
  0x3e   : > { %v579_v55 = vpop.eup %578  ;;  %590 = vpow2.f32 %v299_v57  ;;  %v310_v25 = vstv %s775_s6  ;;  %v317_v49 = vstv %s786_s7 }
  0x3f   : > { %v581_v59 = vpop.eup %580  ;;  %v223_v60 = vmul.f32 %v579_v55, %v579_v55  ;;  %592 = vpow2.f32 %v302_v58  ;;  %v340_v26 = vadd.f32 %v339_v5, %v338_v15  ;;  %v343_v27 = vsub.f32 %v339_v5, %v338_v15 }
  0x40   : > { %v221_v63 = vadd.f32 %v581_v59, %v579_v55  ;;  %v224_v0 = vmul.f32 %v581_v59, %v581_v59  ;;  %v583_v6 = vpop.eup %582  ;;  %594 = vpow2.f32 %v293_v62  ;;  %v334_v37 = vadd.f32 %v333_v14, %v331_v12 }
  0x41   : > { %v230_v3 = vmul.f32 %v579_v55, %v223_v60  ;;  %v585_v10 = vpop.eup %584  ;;  %v264_v11 = vmul.f32 %v583_v6, %v583_v6  ;;  %v341_v31 = vmul.f32 1.442695, %v340_v26  ;;  %v344_v32 = vmul.f32 1.442695, %v343_v27 }
  0x42   : > { %v222_v7 = vadd.f32 1.0, %v221_v63  ;;  %v226_v8 = vadd.f32 %v224_v0, %v223_v60  ;;  %v231_v9 = vmul.f32 %v581_v59, %v224_v0  ;;  %v587_v17 = vpop.eup %586  ;;  %v262_v20 = vadd.f32 %v585_v10, %v583_v6 }
  0x43   : > { %v265_v22 = vmul.f32 %v585_v10, %v585_v10  ;;  %v589_v23 = vpop.eup %588  ;;  %v271_v24 = vmul.f32 %v583_v6, %v264_v11  ;;  %596 = vpow2.f32 %v341_v31  ;;  %v279_v55 = vstv %s789_s8 }
  0x44   : > { %v228_v18 = vmul.f32 %v227_v52, %v226_v8  ;;  %v233_v19 = vadd.f32 %v231_v9, %v230_v3  ;;  %v263_v13 = vadd.f32 1.0, %v262_v20  ;;  %v591_v16 = vpop.eup %590  ;;  %598 = vpow2.f32 %v344_v32 }
  0x45   : > { %v267_v21 = vadd.f32 %v265_v22, %v264_v11  ;;  %v272_v30 = vmul.f32 %v585_v10, %v265_v22  ;;  %v593_v33 = vpop.eup %592  ;;  %v306_v36 = vmul.f32 %v591_v16, %v591_v16  ;;  %v321_v2 = vstv %s793_s14 }
  0x46   : > { %v229_v28 = vadd.f32 %v228_v18, %v222_v7  ;;  %v235_v29 = vmul.f32 %v234_v53, %v233_v19  ;;  %v304_v39 = vadd.f32 %v593_v33, %v591_v16  ;;  %v307_v40 = vmul.f32 %v593_v33, %v593_v33  ;;  %v595_v50 = vpop.eup %594 }
  0x47   : > { %v269_v35 = vmul.f32 %v268_v56, %v267_v21  ;;  %v274_v38 = vadd.f32 %v272_v30, %v271_v24  ;;  %v313_v43 = vmul.f32 %v591_v16, %v306_v36  ;;  %v335_v56 = vmul.f32 1.442695, %v334_v37 }
  0x48   : > { %v236_v34 = vadd.f32 %v235_v29, %v229_v28  ;;  %v305_v45 = vadd.f32 1.0, %v304_v39  ;;  %v309_v46 = vadd.f32 %v307_v40, %v306_v36  ;;  %v314_v47 = vmul.f32 %v593_v33, %v307_v40 }
  0x49   : > { %v270_v42 = vadd.f32 %v269_v35, %v263_v13  ;;  %v276_v44 = vmul.f32 %v275_v61, %v274_v38  ;;  %v597_v57 = vpop.eup %596  ;;  %600 = vpow2.f32 %v335_v56  ;;  %v352_v3 = vstv %s795_s15 }
  0x4a   : > { %v237_v41 = vmul.f32 %v587_v17, %v236_v34  ;;  %v311_v52 = vmul.f32 %v310_v25, %v309_v46  ;;  %v316_v53 = vadd.f32 %v314_v47, %v313_v43  ;;  %v599_v60 = vpop.eup %598  ;;  %v348_v61 = vmul.f32 %v597_v57, %v597_v57 }
  0x4b   : > { %v277_v51 = vadd.f32 %v276_v44, %v270_v42  ;;  %v346_v0 = vadd.f32 %v599_v60, %v597_v57  ;;  %v349_v1 = vmul.f32 %v599_v60, %v599_v60  ;;  %v359_v9 = vstv %s800_s9 }
  0x4c   : > { %v239_v48 = vmul.f32 %v238_v54, %v237_v41  ;;  %v312_v59 = vadd.f32 %v311_v52, %v305_v45  ;;  %v318_v54 = vmul.f32 %v317_v49, %v316_v53  ;;  %v355_v4 = vmul.f32 %v597_v57, %v348_v61 }
  0x4d   : > { %v278_v58 = vmul.f32 %v589_v23, %v277_v51  ;;  %v347_v6 = vadd.f32 1.0, %v346_v0  ;;  %v351_v7 = vadd.f32 %v349_v1, %v348_v61  ;;  %v356_v8 = vmul.f32 %v599_v60, %v349_v1 }
  0x4e   : > { %240 = vst [vmem:[%s802_s3] sm:$0xff] %v239_v48  ;;  %v319_v63 = vadd.f32 %v318_v54, %v312_v59  ;;  %v363_v19 = vstv %s523_s17 }
  0x4f   : > { %v280_v62 = vmul.f32 %v279_v55, %v278_v58  ;;  %v353_v11 = vmul.f32 %v352_v3, %v351_v7  ;;  %v358_v12 = vadd.f32 %v356_v8, %v355_v4  ;;  %v601_v17 = vpop.eup %600 }
  0x50   : > { %v320_v5 = vmul.f32 %v595_v50, %v319_v63 }
  0x51   : > { %514 = vst [vmem:[%s802_s3 + $0x8] sm:$0xff] %v280_v62  ;;  %v354_v14 = vadd.f32 %v353_v11, %v347_v6  ;;  %v360_v15 = vmul.f32 %v359_v9, %v358_v12 }
  0x52   : > { %v322_v10 = vmul.f32 %v321_v2, %v320_v5 }
  0x53   : > { %v361_v18 = vadd.f32 %v360_v15, %v354_v14 }
  0x54   : > { %522 = vst [vmem:[%s802_s3 + $0x10] sm:$0xff] %v322_v10 }
  0x55   : > { %v362_v20 = vmul.f32 %v601_v17, %v361_v18  ;;  %373 = sbr.rel (!%p696_p5) target bundleno = 98 (0x62), region = 74  ;;  %v410_v23 = vld [vmem:[%s802_s3] sm:$0xff] (%p696_p5) }
  0x56   : > { %411 = vst [vmem:[%s375_s22] sm:$0xff] (%p696_p5), %v410_v23 }
  0x57   : > { %v364_v22 = vmul.f32 %v363_v19, %v362_v20 }
  0x58   : > { %v412_v24 = vld [vmem:[%s802_s3 + $0x8] sm:$0xff] (%p696_p5) }
  0x59   : > { %530 = vst [vmem:[%s802_s3 + $0x18] sm:$0xff] %v364_v22 }
  0x5a   : > { %413 = vst [vmem:[%s375_s22 + $0x10] sm:$0xff] %v412_v24 }
  0x5b   : > { %v414_v25 = vld [vmem:[%s802_s3 + $0x10] sm:$0xff] }
  0x5c   : > { %415 = vst [vmem:[%s375_s22 + $0x20] sm:$0xff] %v414_v25 }
  0x60   : > { %v416_v26 = vld [vmem:[%s802_s3 + $0x18] sm:$0xff] }
  0x61   : > { %417 = vst [vmem:[%s375_s22 + $0x30] sm:$0xff] %v416_v26 }
  0x62 PF: > { %p10_p13 = scmp.ge.s32.totalorder %s680_s13, 4   ;;  %s838_s9 = smov %s639_s10 }
  0x63   : > { %s839_s10 = smov %s690_s16  ;;  %s840_s11 = smov %s680_s13 }
  0x64   :  { %12 = sbr.rel (!%p10_p13) target bundleno = 2 (0x2), region = 148 }
  0x69   :  { %433 = vsyncpa [#allocation3], 1 }
  0x6a   :  { %435 = vsyncpa [#allocation3 + $0x1], 1 }

</bundles_post_ra>
